<compile_context>
chip_gen: v5e
topology: v5e:2x2
jax: 0.10.0
libtpu: 0.0.40
codegen_flags: <defaults>
</compile_context>

<pallas_src>
import jax
import jax.numpy as jnp
from jax.experimental import pallas as pl
from jax.experimental.pallas import tpu as pltpu

_LANE = 128


def _not_layer_kernel(x_ref, w_ref, o_ref):
    w = w_ref[...]                          # (1, tn) effective weights (compute dtype)
    x = x_ref[...].astype(w.dtype)          # no-op when x already in compute dtype
    o_ref[...] = (x * w).astype(o_ref.dtype)


def _chip_caps():
    """(vmem_capacity_bytes, has_bf16_valu) for the default TPU device."""
    kind = ""
    try:
        kind = jax.devices()[0].device_kind.lower()
    except Exception:
        pass
    try:
        vmem_cap = int(pltpu.get_tpu_info().vmem_capacity_bytes)
    except Exception:
        vmem_cap = (64 << 20) if "7" in kind else (128 << 20)
    # bf16 VALU exists on v6e and later; v5e and older must widen to f32.
    has_bf16_valu = not any(t in kind for t in ("v2", "v3", "v4", "v5"))
    return vmem_cap, has_bf16_valu


def _tile_sizes(b, n, itemsize, budget_bytes):
    """Pick (tb, tn, grid_b, grid_n) for a streaming (b, n) elementwise op."""
    sub = 16 if itemsize == 2 else 8

    # Lane (n) tiling: only when even a minimum-height (sub-row) tile would
    # blow the double-buffered budget (2x input + 2x output buffers).
    if n <= _LANE or 4 * sub * n * itemsize <= budget_bytes:
        tn = n                                            # full dim -> always legal
    else:
        tn = (budget_bytes // (4 * sub * itemsize)) // _LANE * _LANE
        tn = max(_LANE, min(tn, (n // _LANE) * _LANE))    # multiple of 128
    grid_n = pl.cdiv(n, tn)

    # Batch (b) tiling: target ~4 MiB x tiles, within budget, with enough grid
    # steps that a 2-TC chip (v7x) can shard the "parallel" axis.
    if b <= sub:
        tb = b                                            # block dim == full array dim
    else:
        target = max(sub, (4 << 20) // max(1, tn * itemsize))
        cap = max(sub, budget_bytes // (4 * tn * itemsize))
        tb = min(target, cap)
        steps_goal = min(8, pl.cdiv(b, sub))
        if steps_goal > 1:
            per_step = pl.cdiv(pl.cdiv(b, steps_goal), sub) * sub
            tb = min(tb, per_step)
        tb = max(sub, (tb // sub) * sub)                  # multiple of sublane pack
    grid_b = pl.cdiv(b, tb)
    return tb, tn, grid_b, grid_n


def not_layer(x, weights, temp=0.01):
    """Differentiable NOT layer forward: x * (2*sigmoid(weights/temp) - 1).

    x: (..., in_neurons); weights: (in_neurons,). Output keeps x's shape/dtype.
    """
    orig_shape = x.shape
    n = orig_shape[-1]
    if weights.shape != (n,):
        raise ValueError(f"weights shape {weights.shape} != ({n},)")
    x2 = x.reshape(-1, n)
    b = x2.shape[0]
    out_dtype = x.dtype
    itemsize = jnp.dtype(out_dtype).itemsize

    vmem_cap, has_bf16_valu = _chip_caps()
    # Double-buffered footprint cap: ~40 MiB on v7x (64 MiB VMEM/TC),
    # ~80 MiB on v5e/v6e (128 MiB VMEM).
    budget = (40 << 20) if vmem_cap <= (64 << 20) else (80 << 20)

    tb, tn, grid_b, grid_n = _tile_sizes(b, n, itemsize, budget)

    # Effective weights: computed once on the (n,) vector, not per grid step.
    compute_dtype = (
        jnp.bfloat16 if (out_dtype == jnp.bfloat16 and has_bf16_valu) else jnp.float32
    )
    w_f32 = weights.astype(jnp.float32)
    eff_w = (2.0 * jax.nn.sigmoid(w_f32 / temp) - 1.0).astype(compute_dtype)
    eff_w = eff_w.reshape(1, n)

    need = (4 * tb * tn * itemsize                       # 2x in + 2x out buffers
            + 2 * tn * jnp.dtype(compute_dtype).itemsize  # weight row (double-buffered)
            + (1 << 20))
    vmem_limit = int(min(vmem_cap, max(need + (4 << 20), 32 << 20)))

    out = pl.pallas_call(
        _not_layer_kernel,
        out_shape=jax.ShapeDtypeStruct((b, n), out_dtype),
        grid=(grid_b, grid_n),
        in_specs=[
            pl.BlockSpec((tb, tn), lambda i, j: (i, j)),   # x: streamed tiles
            pl.BlockSpec((1, tn), lambda i, j: (0, j)),    # eff_w: resident row
        ],
        out_specs=pl.BlockSpec((tb, tn), lambda i, j: (i, j)),
        compiler_params=pltpu.CompilerParams(
            dimension_semantics=("parallel", "parallel"),
            vmem_limit_bytes=vmem_limit,
        ),
    )(x2, eff_w)

    return out.reshape(orig_shape)


def _reference(x, weights, temp):
    soft_w = jax.nn.sigmoid(weights.astype(jnp.float32) / temp)
    xf = x.astype(jnp.float32)
    return (xf * soft_w + (-xf) * (1.0 - soft_w)).astype(x.dtype)


if __name__ == "__main__":
    key = jax.random.PRNGKey(0)
    k_x, k_w, k_x2, k_w2, k_x3 = jax.random.split(key, 5)
    temp = 0.01

    # Case 1: small aligned shapes, f32.
    batch, in_neurons = 8, 128
    x = jax.random.normal(k_x, (batch, in_neurons), dtype=jnp.float32)
    weights = jax.random.uniform(
        k_w, (in_neurons,), dtype=jnp.float32, minval=-1.0, maxval=1.0
    )
    out = jax.block_until_ready(not_layer(x, weights, temp=temp))
    ref = _reference(x, weights, temp)
    assert out.shape == (batch, in_neurons)
    assert out.dtype == x.dtype
    assert jnp.allclose(out, ref, atol=1e-5, rtol=1e-5)

    # Case 2: unaligned shapes -> partial batch/lane blocks, no wrapper pad/slice.
    batch2, in_neurons2 = 10, 200
    x2 = jax.random.normal(k_x2, (batch2, in_neurons2), dtype=jnp.float32)
    weights2 = jax.random.uniform(
        k_w2, (in_neurons2,), dtype=jnp.float32, minval=-1.0, maxval=1.0
    )
    out2 = jax.block_until_ready(not_layer(x2, weights2, temp=temp))
    ref2 = _reference(x2, weights2, temp)
    assert out2.shape == (batch2, in_neurons2)
    assert jnp.allclose(out2, ref2, atol=1e-5, rtol=1e-5)

    # Case 3: bf16 I/O (native bf16 multiply on v6e/v7x; f32 widening on v5e).
    x3 = jax.random.normal(k_x3, (2, 32), dtype=jnp.float32).astype(jnp.bfloat16)
    w3 = weights[:32]
    out3 = jax.block_until_ready(not_layer(x3, w3, temp=temp))
    ref3 = _reference(x3, w3, temp)
    assert out3.dtype == jnp.bfloat16
    assert jnp.allclose(
        out3.astype(jnp.float32), ref3.astype(jnp.float32), atol=2e-2, rtol=2e-2
    )

    print("KERNEL_OK")
</pallas_src>

<mosaic_0001>
module attributes {stable_mosaic.version = 11 : i64} {
  func.func @_not_layer_kernel(%arg0: i32, %arg1: i32, %arg2: memref<8x128xf32, #tpu.memory_space<vmem>>, %arg3: memref<1x128xf32, #tpu.memory_space<vmem>>, %arg4: memref<8x128xf32, #tpu.memory_space<vmem>>) attributes {dimension_semantics = [#tpu.dimension_semantics<parallel>, #tpu.dimension_semantics<parallel>], iteration_bounds = array<i64: 1, 1>, scalar_prefetch = 0 : i64, scratch_operands = 0 : i64, tpu.core_type = #tpu.core_type<tc>, window_params = [{transform_indices = @transform_0, window_bounds = array<i64: 8, 128>}, {transform_indices = @transform_1, window_bounds = array<i64: 1, 128>}, {transform_indices = @transform_2, window_bounds = array<i64: 8, 128>}]} {
    %c0 = arith.constant 0 : index
    %c0_0 = arith.constant 0 : index
    %0 = vector.load %arg3[%c0, %c0_0] : memref<1x128xf32, #tpu.memory_space<vmem>>, vector<1x128xf32>
    %c0_1 = arith.constant 0 : index
    %c0_2 = arith.constant 0 : index
    %1 = vector.load %arg2[%c0_1, %c0_2] : memref<8x128xf32, #tpu.memory_space<vmem>>, vector<8x128xf32>
    %2 = vector.broadcast %0 : vector<1x128xf32> to vector<8x128xf32>
    %3 = arith.mulf %1, %2 : vector<8x128xf32>
    %c0_3 = arith.constant 0 : index
    %c0_4 = arith.constant 0 : index
    %4 = vector.load %arg4[%c0_3, %c0_4] : memref<8x128xf32, #tpu.memory_space<vmem>>, vector<8x128xf32>
    tpu.vector_store %arg4[%c0_3, %c0_4], %3 {strides = array<i32>} : memref<8x128xf32, #tpu.memory_space<vmem>>, vector<8x128xf32>,
    return
  }
  func.func @transform_0(%arg0: i32, %arg1: i32) -> (i32, i32) {
    %c0_i32 = arith.constant 0 : i32
    return %arg0, %arg1 : i32, i32
  }
  func.func @transform_1(%arg0: i32, %arg1: i32) -> (i32, i32) {
    %c0_i32 = arith.constant 0 : i32
    %c0_i32_0 = arith.constant 0 : i32
    return %c0_i32, %arg1 : i32, i32
  }
  func.func @transform_2(%arg0: i32, %arg1: i32) -> (i32, i32) {
    %c0_i32 = arith.constant 0 : i32
    return %arg0, %arg1 : i32, i32
  }
}

</mosaic_0001>

<bundles_post_ra>
// kernel: tpu_custom_call.1
= control target key start
LH: loop header
LB: loop body
LE: loop exit
PB: predicated region body
PF: predicated region fallthrough
CT: control target
= control target key end

     0   :  { %7 = vsyncpa [#allocation3], 0  ;;  %s174_s0 = inlined_call_operand.hbm [shape: f32[8,128], index: 0, kind: input, shape index: {}]   ;;  %s175_s1 = inlined_call_operand.hbm [shape: f32[1,128], index: 1, kind: input, shape index: {}]   ;;  %s176_s2 = inlined_call_operand.hbm [shape: f32[8,128], index: 2, kind: output, shape index: {}]  }
   0x1   :  { %8 = vsyncpa [#allocation6], 0 }
   0x2   :  { %9 = vsyncpa [#allocation4], 0  ;;  %s15_s11 = sshll.u32 %s174_s0, 4  ;;  %s147_s12 = smov [#allocation2]   ;;  %s16_s11 = int_to_ptr.hbm [resolvable:$true] %s15_s11 }
   0x3   :  { %s17_s13 = sshll.u32 %s147_s12, 4  ;;  %s26_s16 = sshll.u32 %s175_s1, 4  ;;  %s18_s13 = int_to_ptr.vmem [resolvable:$true] %s17_s13  ;;  %s27_s16 = int_to_ptr.hbm [resolvable:$true] %s26_s16 }
   0x4   :  { %20 = dma.hbm_to_vmem [thread:$0]  %s16_s11, 128, %s18_s13, [#allocation3]  }
   0x5   :  { %s148_s17 = smov [#allocation5]  }
   0x6   :  { %s28_s18 = sshll.u32 %s148_s17, 4  ;;  %s29_s18 = int_to_ptr.vmem [resolvable:$true] %s28_s18 }
   0x7   :  { %31 = dma.hbm_to_vmem [thread:$0]  %s27_s16, 16, %s29_s18, [#allocation6]  }
   0x8   :  { %141 = dma.done.wait [#allocation3], 128  }
   0x9   :  { %142 = vsyncadd [#allocation3], 4294967168 }
   0xa   :  { %143 = dma.done.wait [#allocation6], 16  }
   0xb   :  { %144 = vsyncadd [#allocation6], 4294967280  ;;  %s149_s19 = smov [#allocation7]   ;;  %s54_s22 = sshll.u32 %s176_s2, 4  ;;  %v41_v0 = vld [vmem:[#allocation2] sm:$0xff]  ;;  %s55_s22 = int_to_ptr.hbm [resolvable:$true] %s54_s22 }
   0xc   :  { %s52_s0 = sshll.u32 %s149_s19, 4  ;;  %v68_v1 = vld [vmem:[#allocation5] ss:$0 sm:$0xff]  ;;  %s53_s0 = int_to_ptr.vmem [resolvable:$true] %s52_s0 }
   0xd   :  { %v45_v2 = vmul.f32 %v68_v1, %v41_v0 }
   0xf   :  { %46 = vst [vmem:[#allocation7] sm:$0xff] %v45_v2 }
  0x10   :  { %57 = dma.vmem_to_hbm [thread:$0]  %s53_s0, 128, %s55_s22, [#allocation4]  }
  0x11   :  { %145 = dma.done.wait [#allocation4], 128  }
  0x12   :  { %146 = vsyncadd [#allocation4], 4294967168 }
  0x13   :  { %62 = vsyncpa [#allocation3], 1 }
  0x14   :  { %63 = vsyncpa [#allocation6], 1 }
  0x15   :  { %64 = vsyncpa [#allocation4], 1 }

</bundles_post_ra>
